<compile_context>
chip_gen: v7x
topology: tpu7x:2x2x1
jax: 0.10.0
libtpu: 0.0.40
codegen_flags: <defaults>
</compile_context>

<pallas_src>
import jax
import jax.numpy as jnp
from jax.experimental import pallas as pl
from jax.experimental.pallas import tpu as pltpu

NUMBER_OF_LABELS = 10
LANE = 128            # lane width for the padded hidden tail layers
SUBLANE_BF16 = 16     # bf16 sublane pack
DEFAULT_TB = 1024     # batch tile (review: 1024-2048 amortizes per-step overhead)


def _round_up(n, m):
    return ((n + m - 1) // m) * m


def _mlp_kernel(x_ref,
                w0_ref, b0_ref,
                w1_ref, b1_ref,
                w2_ref, b2_ref,
                w3_ref, b3_ref,
                w4_ref, b4_ref,
                w5_ref, b5_ref,
                out_ref):
    """One batch tile of the fused forward: 5x (Linear+ReLU), Linear, log_softmax."""

    def linear_relu_bf16(h, w_ref, b_ref):
        # bf16 x bf16 -> f32 accumulation on the MXU, ReLU in f32, carry bf16.
        y = jnp.dot(h, w_ref[...], preferred_element_type=jnp.float32) + b_ref[...]
        return jnp.maximum(y, 0.0).astype(jnp.bfloat16)

    h = linear_relu_bf16(x_ref[...], w0_ref, b0_ref)  # d_in_pad -> 128
    h = linear_relu_bf16(h, w1_ref, b1_ref)           # 128 -> 64
    h = linear_relu_bf16(h, w2_ref, b2_ref)           # 64  -> 128 (10 real + 118 zero lanes)
    h = linear_relu_bf16(h, w3_ref, b3_ref)           # 128 -> 128 (zero-padded 10x10)
    h = linear_relu_bf16(h, w4_ref, b4_ref)           # 128 -> 128 (zero-padded 10x10)

    # Final layer produces the true 10-wide logits in f32 (no padded class lanes).
    logits = jnp.dot(h, w5_ref[...],
                     preferred_element_type=jnp.float32) + b5_ref[...]

    # log_softmax along the class dim; exp/log go to the EUP slot.
    m = jnp.max(logits, axis=-1, keepdims=True)
    shifted = logits - m
    lse = jnp.log(jnp.sum(jnp.exp(shifted), axis=-1, keepdims=True))
    out_ref[...] = shifted - lse                      # (TB, 10) f32 store


def _prepare_params(params, d_in_pad):
    """Pad/cast the logical (W, b) list into the kernel operand layout."""
    (w0, b0), (w1, b1), (w2, b2), (w3, b3), (w4, b4), (w5, b5) = params
    d_in = w0.shape[0]

    def pad_cols(a):
        return jnp.pad(a, ((0, 0), (0, LANE - a.shape[1])))

    def pad_rows(a):
        return jnp.pad(a, ((0, LANE - a.shape[0]), (0, 0)))

    w0p = jnp.pad(w0, ((0, d_in_pad - d_in), (0, 0)))

    return [
        w0p.astype(jnp.bfloat16),                      b0.astype(jnp.float32),
        w1.astype(jnp.bfloat16),                       b1.astype(jnp.float32),
        pad_cols(w2).astype(jnp.bfloat16),             pad_cols(b2).astype(jnp.float32),
        pad_cols(pad_rows(w3)).astype(jnp.bfloat16),   pad_cols(b3).astype(jnp.float32),
        pad_cols(pad_rows(w4)).astype(jnp.bfloat16),   pad_cols(b4).astype(jnp.float32),
        pad_rows(w5).astype(jnp.bfloat16),             b5.astype(jnp.float32),
    ]


def model_e_forward(x, params, tb=DEFAULT_TB):
    """x: any shape flattening to (B, input_size). params: [(W(in,out), b(1,out))]*6."""
    d_in = params[0][0].shape[0]
    x = x.reshape(-1, d_in)                       # mirrors x.view(-1, input_size)
    batch = x.shape[0]

    # Lane-align the streamed input (the only per-step HBM read stream).
    d_in_pad = _round_up(d_in, LANE)

    # Batch tile: multiple of 16 (bf16 sublane pack), capped by padded batch.
    tb = min(tb, _round_up(batch, SUBLANE_BF16))
    # Keep >= 2 grid steps when batch is big enough so the "parallel" batch
    # axis can shard across v7x's 2 TensorCores (no effect on v5e/v6e).
    if batch > 2 * SUBLANE_BF16 and _round_up(batch, tb) // tb < 2:
        tb = _round_up(-(-batch // 2), SUBLANE_BF16)
    b_pad = _round_up(batch, tb)

    x = x.astype(jnp.bfloat16)                    # halve the dominant HBM stream
    pad_b, pad_d = b_pad - batch, d_in_pad - d_in
    if pad_b or pad_d:
        x = jnp.pad(x, ((0, pad_b), (0, pad_d)))

    flat = _prepare_params(params, d_in_pad)
    grid = (b_pad // tb,)

    # x streams per grid step; weights/biases use a constant index_map so the
    # pipeline keeps them VMEM-resident across the whole grid (never re-fetched).
    in_specs = [pl.BlockSpec((tb, d_in_pad), lambda i: (i, 0))]
    for op in flat:
        in_specs.append(pl.BlockSpec(op.shape, lambda i: (0, 0)))

    flops = 2 * b_pad * (d_in_pad * 128 + 128 * 64 + 64 * LANE
                         + 2 * LANE * LANE + LANE * NUMBER_OF_LABELS)
    bytes_accessed = (x.size * x.dtype.itemsize
                      + sum(o.size * o.dtype.itemsize for o in flat)
                      + b_pad * NUMBER_OF_LABELS * 4)

    out = pl.pallas_call(
        _mlp_kernel,
        out_shape=jax.ShapeDtypeStruct((b_pad, NUMBER_OF_LABELS), jnp.float32),
        grid=grid,
        in_specs=in_specs,
        out_specs=pl.BlockSpec((tb, NUMBER_OF_LABELS), lambda i: (i, 0)),
        compiler_params=pltpu.CompilerParams(
            dimension_semantics=("parallel",)),
        cost_estimate=pl.CostEstimate(
            flops=flops,
            transcendentals=b_pad * (NUMBER_OF_LABELS + 1),
            bytes_accessed=bytes_accessed),
    )(x, *flat)

    # Only batch padding to drop; class dim is already exactly 10.
    return out[:batch] if pad_b else out


def model_e_reference(x, params):
    """Pure-JAX reference with the same dtype path (bf16 matmuls, f32 accum)."""
    d_in = params[0][0].shape[0]
    h = x.reshape(-1, d_in).astype(jnp.bfloat16)
    for w, b in params[:-1]:
        y = jnp.dot(h, w.astype(jnp.bfloat16),
                    preferred_element_type=jnp.float32) + b
        h = jnp.maximum(y, 0.0).astype(jnp.bfloat16)
    w, b = params[-1]
    logits = jnp.dot(h, w.astype(jnp.bfloat16),
                     preferred_element_type=jnp.float32) + b
    return jax.nn.log_softmax(logits, axis=-1)


def init_params(key, input_size):
    """Deterministic init matching ModelE's layer shapes (stored as (in, out))."""
    dims = [(input_size, 128), (128, 64), (64, 10), (10, 10), (10, 10),
            (10, NUMBER_OF_LABELS)]
    params = []
    for i, (fan_in, fan_out) in enumerate(dims):
        kw, kb, key = jax.random.split(jax.random.fold_in(key, i), 3)
        bound = 1.0 / jnp.sqrt(fan_in)  # PyTorch nn.Linear default uniform bound
        w = jax.random.uniform(kw, (fan_in, fan_out), jnp.float32, -bound, bound)
        b = jax.random.uniform(kb, (1, fan_out), jnp.float32, -bound, bound)
        params.append((w, b))
    return params


# TODO(synk): the Adam optimizer / training step in ModelE has no Pallas
# equivalent here; only the forward pass is implemented.

if __name__ == "__main__":
    key = jax.random.PRNGKey(0)
    batch = 8
    input_size = 200  # not a multiple of 128 -> exercises the d_in lane-padding path

    kx, kp = jax.random.split(key)
    x = jax.random.normal(kx, (batch, input_size), jnp.float32)
    params = init_params(kp, input_size)

    out = model_e_forward(x, params)
    out = jax.block_until_ready(out)
    assert out.shape == (batch, NUMBER_OF_LABELS)

    # Sanity 1: log_softmax rows sum to 1 in probability space.
    row_sums = jnp.sum(jnp.exp(out), axis=1)
    assert jnp.allclose(row_sums, jnp.ones_like(row_sums), atol=1e-5)

    # Sanity 2: matches a pure-JAX reference with the same dtype path.
    ref = model_e_reference(x, params)
    assert jnp.allclose(out, ref, atol=2e-2, rtol=2e-2)

    print("KERNEL_OK")
</pallas_src>

<mosaic_0001>
module attributes {stable_mosaic.version = 11 : i64} {
  func.func @_mlp_kernel(%arg0: i32, %arg1: memref<16x256xbf16, #tpu.memory_space<vmem>>, %arg2: memref<256x128xbf16, #tpu.memory_space<vmem>>, %arg3: memref<1x128xf32, #tpu.memory_space<vmem>>, %arg4: memref<128x64xbf16, #tpu.memory_space<vmem>>, %arg5: memref<1x64xf32, #tpu.memory_space<vmem>>, %arg6: memref<64x128xbf16, #tpu.memory_space<vmem>>, %arg7: memref<1x128xf32, #tpu.memory_space<vmem>>, %arg8: memref<128x128xbf16, #tpu.memory_space<vmem>>, %arg9: memref<1x128xf32, #tpu.memory_space<vmem>>, %arg10: memref<128x128xbf16, #tpu.memory_space<vmem>>, %arg11: memref<1x128xf32, #tpu.memory_space<vmem>>, %arg12: memref<128x10xbf16, #tpu.memory_space<vmem>>, %arg13: memref<1x10xf32, #tpu.memory_space<vmem>>, %arg14: memref<16x10xf32, #tpu.memory_space<vmem>>) attributes {dimension_semantics = [#tpu.dimension_semantics<parallel>], iteration_bounds = array<i64: 1>, scalar_prefetch = 0 : i64, scratch_operands = 0 : i64, tpu.core_type = #tpu.core_type<tc>, window_params = [{transform_indices = @transform_0, window_bounds = array<i64: 16, 256>}, {pipeline_mode = #tpu.pipeline_mode<synchronous>, transform_indices = @transform_1, window_bounds = array<i64: 256, 128>}, {pipeline_mode = #tpu.pipeline_mode<synchronous>, transform_indices = @transform_2, window_bounds = array<i64: 1, 128>}, {pipeline_mode = #tpu.pipeline_mode<synchronous>, transform_indices = @transform_3, window_bounds = array<i64: 128, 64>}, {pipeline_mode = #tpu.pipeline_mode<synchronous>, transform_indices = @transform_4, window_bounds = array<i64: 1, 64>}, {pipeline_mode = #tpu.pipeline_mode<synchronous>, transform_indices = @transform_5, window_bounds = array<i64: 64, 128>}, {pipeline_mode = #tpu.pipeline_mode<synchronous>, transform_indices = @transform_6, window_bounds = array<i64: 1, 128>}, {pipeline_mode = #tpu.pipeline_mode<synchronous>, transform_indices = @transform_7, window_bounds = array<i64: 128, 128>}, {pipeline_mode = #tpu.pipeline_mode<synchronous>, transform_indices = @transform_8, window_bounds = array<i64: 1, 128>}, {pipeline_mode = #tpu.pipeline_mode<synchronous>, transform_indices = @transform_9, window_bounds = array<i64: 128, 128>}, {pipeline_mode = #tpu.pipeline_mode<synchronous>, transform_indices = @transform_10, window_bounds = array<i64: 1, 128>}, {pipeline_mode = #tpu.pipeline_mode<synchronous>, transform_indices = @transform_11, window_bounds = array<i64: 128, 10>}, {pipeline_mode = #tpu.pipeline_mode<synchronous>, transform_indices = @transform_12, window_bounds = array<i64: 1, 10>}, {transform_indices = @transform_13, window_bounds = array<i64: 16, 10>}]} {
    %c0 = arith.constant 0 : index
    %c0_0 = arith.constant 0 : index
    %0 = vector.load %arg1[%c0, %c0_0] : memref<16x256xbf16, #tpu.memory_space<vmem>>, vector<16x256xbf16>
    %c0_1 = arith.constant 0 : index
    %c0_2 = arith.constant 0 : index
    %1 = vector.load %arg2[%c0_1, %c0_2] : memref<256x128xbf16, #tpu.memory_space<vmem>>, vector<256x128xbf16>
    %cst = arith.constant dense<0.000000e+00> : vector<16x128xf32>
    %2 = tpu.matmul %0, %1, %cst {dimension_numbers = #tpu.dot_dimension_numbers<[1], [0], [0], [1], [0, 0, 1, 1], [], []>} : vector<16x256xbf16>, vector<256x128xbf16>, vector<16x128xf32> -> vector<16x128xf32>
    %c0_3 = arith.constant 0 : index
    %c0_4 = arith.constant 0 : index
    %3 = vector.load %arg3[%c0_3, %c0_4] : memref<1x128xf32, #tpu.memory_space<vmem>>, vector<1x128xf32>
    %4 = vector.broadcast %3 : vector<1x128xf32> to vector<16x128xf32>
    %5 = arith.addf %2, %4 : vector<16x128xf32>
    %cst_5 = arith.constant 0.000000e+00 : f32
    %6 = vector.broadcast %cst_5 : f32 to vector<16x128xf32>
    %7 = arith.maximumf %5, %6 : vector<16x128xf32>
    %8 = arith.truncf %7 : vector<16x128xf32> to vector<16x128xbf16>
    %c0_6 = arith.constant 0 : index
    %c0_7 = arith.constant 0 : index
    %9 = vector.load %arg4[%c0_6, %c0_7] : memref<128x64xbf16, #tpu.memory_space<vmem>>, vector<128x64xbf16>
    %cst_8 = arith.constant dense<0.000000e+00> : vector<16x64xf32>
    %10 = tpu.matmul %8, %9, %cst_8 {dimension_numbers = #tpu.dot_dimension_numbers<[1], [0], [0], [1], [0, 0, 1, 1], [], []>} : vector<16x128xbf16>, vector<128x64xbf16>, vector<16x64xf32> -> vector<16x64xf32>
    %c0_9 = arith.constant 0 : index
    %c0_10 = arith.constant 0 : index
    %11 = vector.load %arg5[%c0_9, %c0_10] : memref<1x64xf32, #tpu.memory_space<vmem>>, vector<1x64xf32>
    %12 = vector.broadcast %11 : vector<1x64xf32> to vector<16x64xf32>
    %13 = arith.addf %10, %12 : vector<16x64xf32>
    %cst_11 = arith.constant 0.000000e+00 : f32
    %14 = vector.broadcast %cst_11 : f32 to vector<16x64xf32>
    %15 = arith.maximumf %13, %14 : vector<16x64xf32>
    %16 = arith.truncf %15 : vector<16x64xf32> to vector<16x64xbf16>
    %c0_12 = arith.constant 0 : index
    %c0_13 = arith.constant 0 : index
    %17 = vector.load %arg6[%c0_12, %c0_13] : memref<64x128xbf16, #tpu.memory_space<vmem>>, vector<64x128xbf16>
    %cst_14 = arith.constant dense<0.000000e+00> : vector<16x128xf32>
    %18 = tpu.matmul %16, %17, %cst_14 {dimension_numbers = #tpu.dot_dimension_numbers<[1], [0], [0], [1], [0, 0, 1, 1], [], []>} : vector<16x64xbf16>, vector<64x128xbf16>, vector<16x128xf32> -> vector<16x128xf32>
    %c0_15 = arith.constant 0 : index
    %c0_16 = arith.constant 0 : index
    %19 = vector.load %arg7[%c0_15, %c0_16] : memref<1x128xf32, #tpu.memory_space<vmem>>, vector<1x128xf32>
    %20 = vector.broadcast %19 : vector<1x128xf32> to vector<16x128xf32>
    %21 = arith.addf %18, %20 : vector<16x128xf32>
    %cst_17 = arith.constant 0.000000e+00 : f32
    %22 = vector.broadcast %cst_17 : f32 to vector<16x128xf32>
    %23 = arith.maximumf %21, %22 : vector<16x128xf32>
    %24 = arith.truncf %23 : vector<16x128xf32> to vector<16x128xbf16>
    %c0_18 = arith.constant 0 : index
    %c0_19 = arith.constant 0 : index
    %25 = vector.load %arg8[%c0_18, %c0_19] : memref<128x128xbf16, #tpu.memory_space<vmem>>, vector<128x128xbf16>
    %cst_20 = arith.constant dense<0.000000e+00> : vector<16x128xf32>
    %26 = tpu.matmul %24, %25, %cst_20 {dimension_numbers = #tpu.dot_dimension_numbers<[1], [0], [0], [1], [0, 0, 1, 1], [], []>} : vector<16x128xbf16>, vector<128x128xbf16>, vector<16x128xf32> -> vector<16x128xf32>
    %c0_21 = arith.constant 0 : index
    %c0_22 = arith.constant 0 : index
    %27 = vector.load %arg9[%c0_21, %c0_22] : memref<1x128xf32, #tpu.memory_space<vmem>>, vector<1x128xf32>
    %28 = vector.broadcast %27 : vector<1x128xf32> to vector<16x128xf32>
    %29 = arith.addf %26, %28 : vector<16x128xf32>
    %cst_23 = arith.constant 0.000000e+00 : f32
    %30 = vector.broadcast %cst_23 : f32 to vector<16x128xf32>
    %31 = arith.maximumf %29, %30 : vector<16x128xf32>
    %32 = arith.truncf %31 : vector<16x128xf32> to vector<16x128xbf16>
    %c0_24 = arith.constant 0 : index
    %c0_25 = arith.constant 0 : index
    %33 = vector.load %arg10[%c0_24, %c0_25] : memref<128x128xbf16, #tpu.memory_space<vmem>>, vector<128x128xbf16>
    %cst_26 = arith.constant dense<0.000000e+00> : vector<16x128xf32>
    %34 = tpu.matmul %32, %33, %cst_26 {dimension_numbers = #tpu.dot_dimension_numbers<[1], [0], [0], [1], [0, 0, 1, 1], [], []>} : vector<16x128xbf16>, vector<128x128xbf16>, vector<16x128xf32> -> vector<16x128xf32>
    %c0_27 = arith.constant 0 : index
    %c0_28 = arith.constant 0 : index
    %35 = vector.load %arg11[%c0_27, %c0_28] : memref<1x128xf32, #tpu.memory_space<vmem>>, vector<1x128xf32>
    %36 = vector.broadcast %35 : vector<1x128xf32> to vector<16x128xf32>
    %37 = arith.addf %34, %36 : vector<16x128xf32>
    %cst_29 = arith.constant 0.000000e+00 : f32
    %38 = vector.broadcast %cst_29 : f32 to vector<16x128xf32>
    %39 = arith.maximumf %37, %38 : vector<16x128xf32>
    %40 = arith.truncf %39 : vector<16x128xf32> to vector<16x128xbf16>
    %c0_30 = arith.constant 0 : index
    %c0_31 = arith.constant 0 : index
    %41 = vector.load %arg12[%c0_30, %c0_31] : memref<128x10xbf16, #tpu.memory_space<vmem>>, vector<128x10xbf16>
    %cst_32 = arith.constant dense<0.000000e+00> : vector<16x10xf32>
    %42 = tpu.matmul %40, %41, %cst_32 {dimension_numbers = #tpu.dot_dimension_numbers<[1], [0], [0], [1], [0, 0, 1, 1], [], []>} : vector<16x128xbf16>, vector<128x10xbf16>, vector<16x10xf32> -> vector<16x10xf32>
    %c0_33 = arith.constant 0 : index
    %c0_34 = arith.constant 0 : index
    %43 = vector.load %arg13[%c0_33, %c0_34] : memref<1x10xf32, #tpu.memory_space<vmem>>, vector<1x10xf32>
    %44 = vector.broadcast %43 : vector<1x10xf32> to vector<16x10xf32>
    %45 = arith.addf %42, %44 : vector<16x10xf32>
    %cst_35 = arith.constant dense<0xFF800000> : vector<16xf32>
    %46 = vector.multi_reduction <maximumf>, %45, %cst_35 [1] : vector<16x10xf32> to vector<16xf32>
    %47 = vector.shape_cast %46 : vector<16xf32> to vector<16x1xf32>
    %48 = vector.broadcast %47 : vector<16x1xf32> to vector<16x10xf32>
    %49 = arith.subf %45, %48 : vector<16x10xf32>
    %50 = math.exp %49 : vector<16x10xf32>
    %cst_36 = arith.constant dense<0.000000e+00> : vector<16xf32>
    %51 = vector.multi_reduction <add>, %50, %cst_36 [1] : vector<16x10xf32> to vector<16xf32>
    %52 = vector.shape_cast %51 : vector<16xf32> to vector<16x1xf32>
    %53 = math.log %52 : vector<16x1xf32>
    %54 = vector.broadcast %53 : vector<16x1xf32> to vector<16x10xf32>
    %55 = arith.subf %49, %54 : vector<16x10xf32>
    %c0_37 = arith.constant 0 : index
    %c0_38 = arith.constant 0 : index
    %56 = vector.load %arg14[%c0_37, %c0_38] : memref<16x10xf32, #tpu.memory_space<vmem>>, vector<16x10xf32>
    tpu.vector_store %arg14[%c0_37, %c0_38], %55 {strides = array<i32>} : memref<16x10xf32, #tpu.memory_space<vmem>>, vector<16x10xf32>,
    return
  }
  func.func @transform_0(%arg0: i32) -> (i32, i32) {
    %c0_i32 = arith.constant 0 : i32
    %c0_i32_0 = arith.constant 0 : i32
    return %arg0, %c0_i32 : i32, i32
  }
  func.func @transform_1(%arg0: i32) -> (i32, i32) {
    %c0_i32 = arith.constant 0 : i32
    %c0_i32_0 = arith.constant 0 : i32
    %c0_i32_1 = arith.constant 0 : i32
    return %c0_i32, %c0_i32_0 : i32, i32
  }
  func.func @transform_2(%arg0: i32) -> (i32, i32) {
    %c0_i32 = arith.constant 0 : i32
    %c0_i32_0 = arith.constant 0 : i32
    %c0_i32_1 = arith.constant 0 : i32
    return %c0_i32, %c0_i32_0 : i32, i32
  }
  func.func @transform_3(%arg0: i32) -> (i32, i32) {
    %c0_i32 = arith.constant 0 : i32
    %c0_i32_0 = arith.constant 0 : i32
    %c0_i32_1 = arith.constant 0 : i32
    return %c0_i32, %c0_i32_0 : i32, i32
  }
  func.func @transform_4(%arg0: i32) -> (i32, i32) {
    %c0_i32 = arith.constant 0 : i32
    %c0_i32_0 = arith.constant 0 : i32
    %c0_i32_1 = arith.constant 0 : i32
    return %c0_i32, %c0_i32_0 : i32, i32
  }
  func.func @transform_5(%arg0: i32) -> (i32, i32) {
    %c0_i32 = arith.constant 0 : i32
    %c0_i32_0 = arith.constant 0 : i32
    %c0_i32_1 = arith.constant 0 : i32
    return %c0_i32, %c0_i32_0 : i32, i32
  }
  func.func @transform_6(%arg0: i32) -> (i32, i32) {
    %c0_i32 = arith.constant 0 : i32
    %c0_i32_0 = arith.constant 0 : i32
    %c0_i32_1 = arith.constant 0 : i32
    return %c0_i32, %c0_i32_0 : i32, i32
  }
  func.func @transform_7(%arg0: i32) -> (i32, i32) {
    %c0_i32 = arith.constant 0 : i32
    %c0_i32_0 = arith.constant 0 : i32
    %c0_i32_1 = arith.constant 0 : i32
    return %c0_i32, %c0_i32_0 : i32, i32
  }
  func.func @transform_8(%arg0: i32) -> (i32, i32) {
    %c0_i32 = arith.constant 0 : i32
    %c0_i32_0 = arith.constant 0 : i32
    %c0_i32_1 = arith.constant 0 : i32
    return %c0_i32, %c0_i32_0 : i32, i32
  }
  func.func @transform_9(%arg0: i32) -> (i32, i32) {
    %c0_i32 = arith.constant 0 : i32
    %c0_i32_0 = arith.constant 0 : i32
    %c0_i32_1 = arith.constant 0 : i32
    return %c0_i32, %c0_i32_0 : i32, i32
  }
  func.func @transform_10(%arg0: i32) -> (i32, i32) {
    %c0_i32 = arith.constant 0 : i32
    %c0_i32_0 = arith.constant 0 : i32
    %c0_i32_1 = arith.constant 0 : i32
    return %c0_i32, %c0_i32_0 : i32, i32
  }
  func.func @transform_11(%arg0: i32) -> (i32, i32) {
    %c0_i32 = arith.constant 0 : i32
    %c0_i32_0 = arith.constant 0 : i32
    %c0_i32_1 = arith.constant 0 : i32
    return %c0_i32, %c0_i32_0 : i32, i32
  }
  func.func @transform_12(%arg0: i32) -> (i32, i32) {
    %c0_i32 = arith.constant 0 : i32
    %c0_i32_0 = arith.constant 0 : i32
    %c0_i32_1 = arith.constant 0 : i32
    return %c0_i32, %c0_i32_0 : i32, i32
  }
  func.func @transform_13(%arg0: i32) -> (i32, i32) {
    %c0_i32 = arith.constant 0 : i32
    %c0_i32_0 = arith.constant 0 : i32
    return %arg0, %c0_i32 : i32, i32
  }
}

</mosaic_0001>

<bundles_post_ra>
// kernel: tpu_custom_call.1
= control target key start
LH: loop header
LB: loop body
LE: loop exit
PB: predicated region body
PF: predicated region fallthrough
CT: control target
= control target key end

     0   :  { %18 = vsyncpa [#allocation3], 0  ;;  %s1672_s0 = inlined_call_operand.hbm [shape: bf16[16,256], index: 0, kind: input, shape index: {}]   ;;  %s1673_s1 = inlined_call_operand.vmem [shape: bf16[256,128], index: 1, kind: input, shape index: {}]   ;;  %s1674_s2 = inlined_call_operand.vmem [shape: f32[1,128], index: 2, kind: input, shape index: {}]   ;;  %s1675_s3 = inlined_call_operand.vmem [shape: bf16[128,64], index: 3, kind: input, shape index: {}]   ;;  %s1676_s4 = inlined_call_operand.vmem [shape: f32[1,64], index: 4, kind: input, shape index: {}]   ;;  %s1677_s5 = inlined_call_operand.hbm [shape: bf16[64,128], index: 5, kind: input, shape index: {}]   ;;  %s1678_s6 = inlined_call_operand.hbm [shape: f32[1,128], index: 6, kind: input, shape index: {}]   ;;  %s1679_s7 = inlined_call_operand.vmem [shape: bf16[128,128], index: 7, kind: input, shape index: {}]   ;;  %s1680_s8 = inlined_call_operand.hbm [shape: f32[1,128], index: 8, kind: input, shape index: {}]   ;;  %s1681_s9 = inlined_call_operand.hbm [shape: bf16[128,128], index: 9, kind: input, shape index: {}]   ;;  %s1682_s10 = inlined_call_operand.vmem [shape: f32[1,128], index: 10, kind: input, shape index: {}]   ;;  %s1683_s11 = inlined_call_operand.vmem [shape: bf16[128,10], index: 11, kind: input, shape index: {}]   ;;  %s1684_s12 = inlined_call_operand.vmem [shape: f32[1,10], index: 12, kind: input, shape index: {}]   ;;  %s1685_s13 = inlined_call_operand.hbm [shape: f32[16,10], index: 13, kind: output, shape index: {}]  }
   0x1   :  { %19 = vsyncpa [#allocation6], 0 }
   0x2   :  { %20 = vsyncpa [#allocation9], 0 }
   0x3   :  { %21 = vsyncpa [#allocation4], 0  ;;  %s1322_s25 = smov [#allocation5]   ;;  %s1182_s29 = scalar_lea.hbm %s1677_s5, 512 }
   0x4   :  { %s47_s26 = sshll.u32 %s1322_s25, 4  ;;  %p1183_p0 = scmp.ne.s32.totalorder %s1677_s5, %s1182_s29  ;;  %s48_s26 = int_to_ptr.vmem [resolvable:$true] %s47_s26 }
   0x5   :  { %p1186_p1 = scmp.lt.u32.totalorder %s1182_s29, %s1677_s5 }
   0x7   :  { %p1188_p2 = pnand %p1186_p1, %p1183_p0 }
   0x9   :  { %1191 = shalt.err (!%p1188_p2)
}
   0xa   :  { %s1192_s17 = scalar_lea.vmem %s48_s26, 512  ;;  %p1197_p4 = scmp.lt.s32.totalorder %s48_s26, %s48_s26 }
   0xb   :  { %p1193_p3 = scmp.ne.s32.totalorder %s48_s26, %s1192_s17  ;;  %p1198_p5 = scmp.lt.s32.totalorder %s1192_s17, %s1192_s17 }
   0xd   :  { %p1199_p6 = por %p1198_p5, %p1197_p4 }
   0xf   :  { %p1200_p7 = pnand %p1199_p6, %p1193_p3 }
  0x11   :  { %1203 = shalt.err (!%p1200_p7)
}
  0x12   :  { %s1323_s18 = smov 64   ;;  %s1324_s19 = smov 4  }
  0x13   :  { %53 = dma.hbm_to_vmem [thread:$0]  %s1677_s5, 512, %s48_s26, [#allocation6], %s1323_s18, %s1323_s18, %s1324_s19  }
  0x14   :  { %s1325_s22 = smov [#allocation8]   ;;  %s1326_s24 = smov [#allocation2]  }
  0x15   :  { %s72_s23 = sshll.u32 %s1325_s22, 4  ;;  %s27_s25 = sshll.u32 %s1326_s24, 4  ;;  %s73_s23 = int_to_ptr.vmem [resolvable:$true] %s72_s23  ;;  %s28_s25 = int_to_ptr.vmem [resolvable:$true] %s27_s25 }
  0x16   :  { %s1204_s29 = scalar_lea.hbm %s1680_s8, 16 }
  0x17   :  { %p1205_p8 = scmp.ne.s32.totalorder %s1680_s8, %s1204_s29  ;;  %p1208_p9 = scmp.lt.u32.totalorder %s1204_s29, %s1680_s8 }
  0x19   :  { %p1210_p10 = pnand %p1208_p9, %p1205_p8 }
  0x1b   :  { %1213 = shalt.err (!%p1210_p10)
}
  0x1c   :  { %s1214_s5 = scalar_lea.vmem %s73_s23, 16  ;;  %s1218_s26 = scalar_lea.vmem %s73_s23, 32 }
  0x1d   :  { %p1215_p11 = scmp.ne.s32.totalorder %s73_s23, %s1214_s5  ;;  %p1219_p12 = scmp.lt.s32.totalorder %s73_s23, %s73_s23 }
  0x1e   :  { %p1220_p13 = scmp.lt.s32.totalorder %s1218_s26, %s1214_s5 }
  0x20   :  { %p1221_p0 = por %p1220_p13, %p1219_p12 }
  0x22   :  { %p1222_p1 = pnand %p1221_p0, %p1215_p11 }
  0x24   :  { %1225 = shalt.err (!%p1222_p1)
}
  0x25   :  { %75 = dma.hbm_to_vmem [thread:$0]  %s1680_s8, 16, %s73_s23, [#allocation9]  }
  0x26   :  { %s1226_s24 = scalar_lea.hbm %s1672_s0, 256 }
  0x27   :  { %p1227_p2 = scmp.ne.s32.totalorder %s1672_s0, %s1226_s24  ;;  %p1230_p3 = scmp.lt.u32.totalorder %s1226_s24, %s1672_s0 }
  0x29   :  { %p1232_p4 = pnand %p1230_p3, %p1227_p2 }
  0x2b   :  { %1235 = shalt.err (!%p1232_p4)
}
  0x2c   :  { %s1236_s14 = scalar_lea.vmem %s28_s25, 256  ;;  %p1241_p6 = scmp.lt.s32.totalorder %s28_s25, %s28_s25 }
  0x2d   :  { %p1237_p5 = scmp.ne.s32.totalorder %s28_s25, %s1236_s14  ;;  %p1242_p7 = scmp.lt.s32.totalorder %s1236_s14, %s1236_s14 }
  0x2f   :  { %p1243_p8 = por %p1242_p7, %p1241_p6 }
  0x31   :  { %p1244_p9 = pnand %p1243_p8, %p1237_p5 }
  0x33   :  { %1247 = shalt.err (!%p1244_p9)
}
  0x34   :  { %s1327_s8 = smov 128   ;;  %s1328_s23 = smov 8  }
  0x35   :  { %33 = dma.hbm_to_vmem [thread:$0]  %s1672_s0, 256, %s28_s25, [#allocation3], %s1327_s8, %s1327_s8, %s1328_s23  }
  0x36   :  { %s1329_s5 = smov [#allocation7]   ;;  %s1330_s17 = smov [#allocation10]  }
  0x37   :  { %s60_s26 = sshll.u32 %s1329_s5, 4  ;;  %s81_s20 = sshll.u32 %s1330_s17, 4  ;;  %s61_s26 = int_to_ptr.vmem [resolvable:$true] %s60_s26  ;;  %s82_s20 = int_to_ptr.vmem [resolvable:$true] %s81_s20 }
  0x38   :  { %s1248_s24 = scalar_lea.hbm %s1678_s6, 16 }
  0x39   :  { %p1249_p10 = scmp.ne.s32.totalorder %s1678_s6, %s1248_s24  ;;  %p1252_p11 = scmp.lt.u32.totalorder %s1248_s24, %s1678_s6 }
  0x3b   :  { %p1254_p12 = pnand %p1252_p11, %p1249_p10 }
  0x3d   :  { %1257 = shalt.err (!%p1254_p12)
}
  0x3e   :  { %s1258_s0 = scalar_lea.vmem %s61_s26, 16  ;;  %s1262_s25 = scalar_lea.vmem %s61_s26, 32 }
  0x3f   :  { %p1259_p13 = scmp.ne.s32.totalorder %s61_s26, %s1258_s0  ;;  %p1263_p0 = scmp.lt.s32.totalorder %s61_s26, %s61_s26 }
  0x40   :  { %p1264_p1 = scmp.lt.s32.totalorder %s1262_s25, %s1258_s0 }
  0x42   :  { %p1265_p2 = por %p1264_p1, %p1263_p0 }
  0x44   :  { %p1266_p3 = pnand %p1265_p2, %p1259_p13 }
  0x46   :  { %1269 = shalt.err (!%p1266_p3)
}
  0x47   :  { %63 = dma.hbm_to_vmem [thread:$0]  %s1678_s6, 16, %s61_s26, [#allocation6]  }
  0x48   :  { %s1270_s17 = scalar_lea.hbm %s1681_s9, 1024 }
  0x49   :  { %p1271_p4 = scmp.ne.s32.totalorder %s1681_s9, %s1270_s17  ;;  %p1274_p5 = scmp.lt.u32.totalorder %s1270_s17, %s1681_s9 }
  0x4b   :  { %p1276_p6 = pnand %p1274_p5, %p1271_p4 }
  0x4d   :  { %1279 = shalt.err (!%p1276_p6)
}
  0x4e   :  { %s1280_s28 = scalar_lea.vmem %s82_s20, 1024  ;;  %p1285_p8 = scmp.lt.s32.totalorder %s82_s20, %s82_s20 }
  0x4f   :  { %p1281_p7 = scmp.ne.s32.totalorder %s82_s20, %s1280_s28  ;;  %p1286_p9 = scmp.lt.s32.totalorder %s1280_s28, %s1280_s28 }
  0x51   :  { %p1287_p10 = por %p1286_p9, %p1285_p8 }
  0x53   :  { %p1288_p11 = pnand %p1287_p10, %p1281_p7 }
  0x55   :  { %1291 = shalt.err (!%p1288_p11)
}
  0x56   :  { %87 = dma.hbm_to_vmem [thread:$0]  %s1681_s9, 1024, %s82_s20, [#allocation9], %s1323_s18, %s1323_s18, %s1324_s19  }
  0x57   :  { %1314 = dma.done.wait [#allocation3], 256  }
  0x58   :  { %1315 = vsyncadd [#allocation3], 4294967040 }
  0x59   :  { %1316 = dma.done.wait [#allocation6], 528  }
  0x5a   :  { %1317 = vsyncadd [#allocation6], 4294966768 }
  0x5b   :  { %1318 = dma.done.wait [#allocation9], 1040  }
  0x5c   :  { %1319 = vsyncadd [#allocation9], 4294966256  ;;  %v1331_v0 = vmov 0.0   ;;  %v1119_v1 = vld [vmem:[%s1673_s1 + $0x40] sm:$0xff]   ;;  %v1121_v3 = vld [vmem:[%s1673_s1 + $0x48] sm:$0xff]   ;;  %vm1332_vm0 = vmmov 0  }
  0x5d   :  { %1015 = vmatprep.subr.bf16.mxu1 %v1331_v0  ;;  %v1120_v2 = vld [vmem:[%s1673_s1] sm:$0xff]   ;;  %952 = vmatprep.subr.bf16.mxu0 %v1119_v1  ;;  %v1122_v4 = vld [vmem:[%s1673_s1 + $0x8] sm:$0xff]   ;;  %v1123_v5 = vld [vmem:[%s1673_s1 + $0x50] sm:$0xff]   ;;  %vm455_vm1 = vcmask 523264   ;;  %vm845_vm2 = vcmask 80896  }
  0x5e   :  { %953 = vmatpush3.bf16.msra.mxu0 %v1120_v2  ;;  %v1124_v6 = vld [vmem:[%s1673_s1 + $0x10] sm:$0xff]   ;;  %v1125_v7 = vld [vmem:[%s1673_s1 + $0x58] sm:$0xff]   ;;  %v1127_v9 = vld [vmem:[%s1673_s1 + $0x60] sm:$0xff]   ;;  %1031 = vmatprep.mubr.msk.bf16.mxu1 %vm1332_vm0, %v1331_v0 }
  0x5f   :  { %954 = vmatprep.subr.bf16.mxu0 %v1121_v3  ;;  %v1126_v8 = vld [vmem:[%s1673_s1 + $0x18] sm:$0xff]   ;;  %v1128_v10 = vld [vmem:[%s1673_s1 + $0x20] sm:$0xff]   ;;  %v1129_v11 = vld [vmem:[%s1673_s1 + $0x68] sm:$0xff]  }
  0x60   :  { %v1130_v12 = vld [vmem:[%s1673_s1 + $0x28] sm:$0xff]   ;;  %v1138_v14 = vld [vmem:[%s1675_s3] sm:$0xff]   ;;  %v1131_v15 = vld [vmem:[%s1673_s1 + $0x70] sm:$0xff]  }
  0x61   :  { %v1137_v13 = vld [vmem:[#allocation2 + $0x4] ss:$8 sps:$4 sm:$0xff]   ;;  %1016 = vmatpush3.bf16.msra.mxu1 %v1138_v14  ;;  %v1132_v17 = vld [vmem:[%s1673_s1 + $0x30] sm:$0xff]   ;;  %v1133_v18 = vld [vmem:[%s1673_s1 + $0x78] sm:$0xff]  }
  0x62   :  { %955 = vmatpush3.bf16.msra.mxu0 %v1122_v4  ;;  %289 = vmatprep.mubr.bf16.mxu0 %v1137_v13  ;;  %v1139_v16 = vld [vmem:[%s1675_s3 + $0x8] sm:$0xff]   ;;  %v1140_v19 = vld [vmem:[%s1675_s3 + $0x10] sm:$0xff]   ;;  %v1134_v20 = vld [vmem:[%s1673_s1 + $0x38] sm:$0xff]  }
  0x63   :  { %956 = vmatprep.subr.bf16.mxu0 %v1123_v5  ;;  %1017 = vmatprep.subr.bf16.mxu1 %v1331_v0  ;;  %v1141_v21 = vld [vmem:[%s1675_s3 + $0x18] sm:$0xff]   ;;  %v1135_v22 = vld [vmem:[#allocation2] ss:$8 sps:$4 sm:$0xff]   ;;  %v1144_v25 = vld [vmem:[%s1675_s3 + $0x30] sm:$0xff]  }
  0x64   :  { %v1142_v23 = vld [vmem:[%s1675_s3 + $0x20] sm:$0xff]   ;;  %v1143_v24 = vld [vmem:[%s1675_s3 + $0x28] sm:$0xff]   ;;  %v1145_v26 = vld [vmem:[%s1675_s3 + $0x38] sm:$0xff]  }
  0x65   :  { %1018 = vmatpush3.bf16.msra.mxu1 %v1139_v16  ;;  %v1146_v27 = vld [vmem:[#allocation5] sm:$0xff]   ;;  %v1147_v28 = vld [vmem:[#allocation5 + $0x8] sm:$0xff]   ;;  %v891_v30 = vld [vmem:[%s1674_s2] ss:$0 sm:$0xff] }
  0x66   :  { %957 = vmatpush3.bf16.msra.mxu0 %v1124_v6  ;;  %1019 = vmatprep.subr.bf16.mxu1 %v1331_v0  ;;  %v1148_v41 = vld [vmem:[#allocation5 + $0x10] sm:$0xff]   ;;  %v1149_v42 = vld [vmem:[#allocation5 + $0x18] sm:$0xff]   ;;  %v1152_v45 = vld [vmem:[%s1679_s7 + $0x10] sm:$0xff]  }
  0x67   :  { %958 = vmatprep.subr.bf16.mxu0 %v1125_v7  ;;  %v1150_v43 = vld [vmem:[%s1679_s7] sm:$0xff]   ;;  %v1151_v44 = vld [vmem:[%s1679_s7 + $0x8] sm:$0xff]   ;;  %v1153_v46 = vld [vmem:[%s1679_s7 + $0x18] sm:$0xff]  }
  0x68   :  { %v1154_v47 = vld [vmem:[%s1679_s7 + $0x20] sm:$0xff]   ;;  %v1155_v48 = vld [vmem:[%s1679_s7 + $0x28] sm:$0xff]   ;;  %v1156_v59 = vld [vmem:[%s1679_s7 + $0x30] sm:$0xff]  }
  0x69   :  { %1020 = vmatpush3.bf16.msra.mxu1 %v1140_v19  ;;  %v910_v49 = vld [vmem:[%s1676_s4] ss:$0 sm:$0xff]  ;;  %v1157_v60 = vld [vmem:[%s1679_s7 + $0x38] sm:$0xff]   ;;  %v1160_v63 = vld [vmem:[#allocation10 + $0x10] sm:$0xff]  }
  0x6a   :  { %959 = vmatpush3.bf16.msra.mxu0 %v1126_v8  ;;  %1021 = vmatprep.subr.bf16.mxu1 %v1331_v0  ;;  %v1158_v61 = vld [vmem:[#allocation10] sm:$0xff]   ;;  %v1159_v62 = vld [vmem:[#allocation10 + $0x8] sm:$0xff]   ;;  %v1161_v1 = vld [vmem:[#allocation10 + $0x18] sm:$0xff]  }
  0x6b   :  { %960 = vmatprep.subr.bf16.mxu0 %v1127_v9  ;;  %v1162_v2 = vld [vmem:[#allocation10 + $0x20] sm:$0xff]   ;;  %v1163_v3 = vld [vmem:[#allocation10 + $0x28] sm:$0xff]   ;;  %v919_v4 = vld [vmem:[#allocation7] ss:$0 sm:$0xff] }
  0x6c   :  { %v1164_v14 = vld [vmem:[#allocation10 + $0x30] sm:$0xff]   ;;  %v1169_v19 = vld [vmem:[%s1683_s11 + $0x18] sm:$0xff]  }
  0x6d   :  { %1022 = vmatpush3.bf16.msra.mxu1 %v1141_v21  ;;  %v1166_v16 = vld [vmem:[%s1683_s11] sm:$0xff]   ;;  %v1171_v21 = vld [vmem:[%s1683_s11 + $0x28] sm:$0xff]  }
  0x6e   :  { %961 = vmatpush3.bf16.msra.mxu0 %v1128_v10  ;;  %1023 = vmatprep.subr.bf16.mxu1 %v1331_v0 }
  0x6f   :  { %962 = vmatprep.subr.bf16.mxu0 %v1129_v11 }
  0x71   :  { %1024 = vmatpush3.bf16.msra.mxu1 %v1142_v23 }
  0x72   :  { %963 = vmatpush3.bf16.msra.mxu0 %v1130_v12  ;;  %1025 = vmatprep.subr.bf16.mxu1 %v1331_v0 }
  0x73   :  { %964 = vmatprep.subr.bf16.mxu0 %v1131_v15  ;;  %v1165_v15 = vld [vmem:[#allocation10 + $0x38] sm:$0xff]  }
  0x75   :  { %1026 = vmatpush3.bf16.msra.mxu1 %v1143_v24 }
  0x76   :  { %965 = vmatpush3.bf16.msra.mxu0 %v1132_v17  ;;  %1027 = vmatprep.subr.bf16.mxu1 %v1331_v0  ;;  %v1167_v17 = vld [vmem:[%s1683_s11 + $0x8] sm:$0xff]  }
  0x77   :  { %966 = vmatprep.subr.bf16.mxu0 %v1133_v18  ;;  %v1168_v18 = vld [vmem:[%s1683_s11 + $0x10] sm:$0xff]  }
  0x79   :  { %1028 = vmatpush3.bf16.msra.mxu1 %v1144_v25 }
  0x7a   :  { %967 = vmatpush3.bf16.msra.mxu0 %v1134_v20  ;;  %1029 = vmatprep.subr.bf16.mxu1 %v1331_v0  ;;  %v1170_v20 = vld [vmem:[%s1683_s11 + $0x20] sm:$0xff]  }
  0x7b   :  { %1035 = vmatprep.subr.bf16.mxu0 %v1331_v0 }
  0x7d   :  { %290 = vmatmul.mubr.bf16.vlgmr.msra.gmra.mrb[0].mxu0 %v1135_v22  ;;  %1030 = vmatpush3.bf16.msra.mxu1 %v1145_v26  ;;  %v925_v22 = vld [vmem:[#allocation8] ss:$0 sm:$0xff] }
  0x7e   :  { %1043 = vmatprep.mubr.msk.bf16.mxu0 %vm1332_vm0, %v1331_v0  ;;  %1047 = vmatprep.subr.bf16.mxu1 %v1331_v0 }
  0x7f   :  { %1036 = vmatpush3.bf16.msra.mxu0 %v1146_v27 }
  0x80   :  { %1037 = vmatprep.subr.bf16.mxu0 %v1331_v0 }
  0x83   :  { %1038 = vmatpush3.bf16.msra.mxu0 %v1147_v28 }
  0x84   :  { %1039 = vmatprep.subr.bf16.mxu0 %v1331_v0 }
  0x87   :  { %1040 = vmatpush3.bf16.msra.mxu0 %v1148_v41 }
  0x88   :  { %1041 = vmatprep.subr.bf16.mxu0 %v1331_v0 }
  0x8b   :  { %1042 = vmatpush3.bf16.msra.mxu0 %v1149_v42 }
  0x8c   :  { %1067 = vmatprep.subr.bf16.mxu0 %v1331_v0 }
 0x150   :  { %v968_v29 = vpop.f32.mrb[0].mxu0 }
 0x151   :  { %v969_v31 = vpop.f32.mrb[1].mxu0 }
 0x152   :  { %v970_v32 = vadd.f32 %v969_v31, %v968_v29  ;;  %v971_v33 = vpop.f32.mrb[2].mxu0 }
 0x153   :  { %v972_v34 = vpop.f32.mrb[3].mxu0 }
 0x154   :  { %v292_v35 = vadd.f32 %v970_v32, %v891_v30  ;;  %v973_v36 = vadd.f32 %v972_v34, %v971_v33  ;;  %v1172_v32 = vld [vmem:[%s1683_s11 + $0x30] sm:$0xff]   ;;  %v1173_v33 = vld [vmem:[%s1683_s11 + $0x38] sm:$0xff]   ;;  %v934_v34 = vld [vmem:[%s1682_s10] ss:$0 sm:$0xff]  ;;  %s1333_s10 = smov [#allocation11]  }
 0x155   :  { %s877_s11 = sshll.u32 %s1333_s10, 4  ;;  %s878_s11 = int_to_ptr.vmem [resolvable:$true] %s877_s11 }
 0x156   :  { %v295_v37 = vadd.f32 %v973_v36, %v891_v30  ;;  %v298_v38 = vmax.f32 %v292_v35, 0.0  ;;  %p1297_p13 = scmp.lt.s32.totalorder %s878_s11, %s878_s11 }
 0x158   :  { %v299_v39 = vmax.f32 %v295_v37, 0.0 }
 0x15a   :  { %v300_v40 = vpack.c.bf16 %v299_v39, %v298_v38 }
 0x15c   :  { %1032 = vmatmul.mubr.bf16.vlgmr.msra.gmra.mrb[0].mxu1 %v300_v40 }
 0x15d   :  { %1063 = vmatprep.mubr.msk.bf16.mxu1 %vm1332_vm0, %v1331_v0  ;;  %1048 = vmatpush3.bf16.msra.mxu1 %v1150_v43 }
 0x15e   :  { %1049 = vmatprep.subr.bf16.mxu1 %v1331_v0 }
 0x161   :  { %1050 = vmatpush3.bf16.msra.mxu1 %v1151_v44 }
 0x162   :  { %1051 = vmatprep.subr.bf16.mxu1 %v1331_v0 }
 0x165   :  { %1052 = vmatpush3.bf16.msra.mxu1 %v1152_v45 }
 0x166   :  { %1053 = vmatprep.subr.bf16.mxu1 %v1331_v0 }
 0x169   :  { %1054 = vmatpush3.bf16.msra.mxu1 %v1153_v46 }
 0x16a   :  { %1055 = vmatprep.subr.bf16.mxu1 %v1331_v0 }
 0x16d   :  { %1056 = vmatpush3.bf16.msra.mxu1 %v1154_v47 }
 0x16e   :  { %1057 = vmatprep.subr.bf16.mxu1 %v1331_v0 }
 0x171   :  { %1058 = vmatpush3.bf16.msra.mxu1 %v1155_v48 }
 0x172   :  { %1059 = vmatprep.subr.bf16.mxu1 %v1331_v0 }
 0x175   :  { %1060 = vmatpush3.bf16.msra.mxu1 %v1156_v59 }
 0x176   :  { %1061 = vmatprep.subr.bf16.mxu1 %v1331_v0 }
 0x179   :  { %1062 = vmatpush3.bf16.msra.mxu1 %v1157_v60 }
 0x17a   :  { %1087 = vmatprep.subr.bf16.mxu1 %v1331_v0 }
 0x22f   :  { %v406_v50 = vpop.f32.mrb[0].mxu1 }
 0x230   :  { %v407_v51 = vadd.f32 %v910_v49, %v406_v50  ;;  %v1033_v52 = vpop.f32.mrb[1].mxu1 }
 0x231   :  { %v409_v53 = vpop.f32.mrb[2].mxu1 }
 0x232   :  { %v410_v54 = vadd.f32 %v910_v49, %v409_v53  ;;  %v1034_v55 = vpop.f32.mrb[3].mxu1  ;;  %v413_v56 = vmax.f32 %v407_v51, 0.0 }
 0x234   :  { %v414_v57 = vmax.f32 %v410_v54, 0.0 }
 0x236   :  { %v415_v58 = vpack.c.bf16 %v414_v57, %v413_v56 }
 0x238   :  { %1044 = vmatmul.mubr.msk.bf16.vlgmr.msra.gmra.mrb[4].mxu0 %vm455_vm1, %v415_v58 }
 0x239   :  { %1083 = vmatprep.mubr.msk.bf16.mxu0 %vm1332_vm0, %v1331_v0  ;;  %1068 = vmatpush3.bf16.msra.mxu0 %v1158_v61 }
 0x23a   :  { %1069 = vmatprep.subr.bf16.mxu0 %v1331_v0 }
 0x23d   :  { %1070 = vmatpush3.bf16.msra.mxu0 %v1159_v62 }
 0x23e   :  { %1071 = vmatprep.subr.bf16.mxu0 %v1331_v0 }
 0x241   :  { %1072 = vmatpush3.bf16.msra.mxu0 %v1160_v63 }
 0x242   :  { %1073 = vmatprep.subr.bf16.mxu0 %v1331_v0 }
 0x245   :  { %1074 = vmatpush3.bf16.msra.mxu0 %v1161_v1 }
 0x246   :  { %1075 = vmatprep.subr.bf16.mxu0 %v1331_v0 }
 0x249   :  { %1076 = vmatpush3.bf16.msra.mxu0 %v1162_v2 }
 0x24a   :  { %1077 = vmatprep.subr.bf16.mxu0 %v1331_v0 }
 0x24d   :  { %1078 = vmatpush3.bf16.msra.mxu0 %v1163_v3 }
 0x24e   :  { %1079 = vmatprep.subr.bf16.mxu0 %v1331_v0 }
 0x251   :  { %1080 = vmatpush3.bf16.msra.mxu0 %v1164_v14 }
 0x252   :  { %1081 = vmatprep.subr.bf16.mxu0 %v1331_v0 }
 0x255   :  { %1082 = vmatpush3.bf16.msra.mxu0 %v1165_v15 }
 0x30b   :  { %v493_v5 = vpop.f32.mrb[4].mxu0 }
 0x30c   :  { %v494_v6 = vadd.f32 %v919_v4, %v493_v5  ;;  %v1045_v7 = vpop.f32.mrb[5].mxu0 }
 0x30d   :  { %v496_v8 = vpop.f32.mrb[6].mxu0 }
 0x30e   :  { %v497_v9 = vadd.f32 %v919_v4, %v496_v8  ;;  %v1046_v10 = vpop.f32.mrb[7].mxu0  ;;  %v500_v11 = vmax.f32 %v494_v6, 0.0 }
 0x310   :  { %v501_v12 = vmax.f32 %v497_v9, 0.0 }
 0x312   :  { %v502_v13 = vpack.c.bf16 %v501_v12, %v500_v11 }
 0x314   :  { %1064 = vmatmul.mubr.bf16.vlgmr.msra.gmra.mrb[4].mxu1 %v502_v13 }
 0x315   :  { %1103 = vmatprep.mubr.msk.bf16.mxu1 %vm1332_vm0, %v1331_v0  ;;  %1088 = vmatpush3.bf16.msra.mxu1 %v1166_v16 }
 0x316   :  { %1089 = vmatprep.subr.bf16.mxu1 %v1331_v0 }
 0x319   :  { %1090 = vmatpush3.bf16.msra.mxu1 %v1167_v17 }
 0x31a   :  { %1091 = vmatprep.subr.bf16.mxu1 %v1331_v0 }
 0x31d   :  { %1092 = vmatpush3.bf16.msra.mxu1 %v1168_v18 }
 0x31e   :  { %1093 = vmatprep.subr.bf16.mxu1 %v1331_v0 }
 0x321   :  { %1094 = vmatpush3.bf16.msra.mxu1 %v1169_v19 }
 0x322   :  { %1095 = vmatprep.subr.bf16.mxu1 %v1331_v0 }
 0x325   :  { %1096 = vmatpush3.bf16.msra.mxu1 %v1170_v20 }
 0x326   :  { %1097 = vmatprep.subr.bf16.mxu1 %v1331_v0 }
 0x329   :  { %1098 = vmatpush3.bf16.msra.mxu1 %v1171_v21 }
 0x32a   :  { %1099 = vmatprep.subr.bf16.mxu1 %v1331_v0 }
 0x32d   :  { %1100 = vmatpush3.bf16.msra.mxu1 %v1172_v32 }
 0x32e   :  { %1101 = vmatprep.subr.bf16.mxu1 %v1331_v0  ;;  %v943_v0 = vld [vmem:[%s1684_s12] ss:$0 sm:$0xff]  ;;  %s1292_s12 = scalar_lea.vmem %s878_s11, 256 }
 0x32f   :  { %p1293_p12 = scmp.ne.s32.totalorder %s878_s11, %s1292_s12  ;;  %p1298_p0 = scmp.lt.s32.totalorder %s1292_s12, %s1292_s12 }
 0x331   :  { %1102 = vmatpush3.bf16.msra.mxu1 %v1173_v33  ;;  %p1299_p1 = por %p1298_p0, %p1297_p13 }
 0x333   :  { %p1300_p2 = pnand %p1299_p1, %p1293_p12 }
 0x3e7   :  { %v608_v23 = vpop.f32.mrb[4].mxu1 }
 0x3e8   :  { %v609_v24 = vadd.f32 %v925_v22, %v608_v23  ;;  %v1065_v25 = vpop.f32.mrb[5].mxu1 }
 0x3e9   :  { %v611_v26 = vpop.f32.mrb[6].mxu1 }
 0x3ea   :  { %v612_v27 = vadd.f32 %v925_v22, %v611_v26  ;;  %v1066_v28 = vpop.f32.mrb[7].mxu1  ;;  %v615_v29 = vmax.f32 %v609_v24, 0.0 }
 0x3ec   :  { %v616_v30 = vmax.f32 %v612_v27, 0.0 }
 0x3ee   :  { %v617_v31 = vpack.c.bf16 %v616_v30, %v615_v29 }
 0x3f0   :  { %1084 = vmatmul.mubr.bf16.vlgmr.msra.gmra.mrb[8].mxu0 %v617_v31 }
 0x4c3   :  { %v723_v35 = vpop.f32.mrb[8].mxu0 }
 0x4c4   :  { %v724_v36 = vadd.f32 %v934_v34, %v723_v35  ;;  %v1085_v37 = vpop.f32.mrb[9].mxu0 }
 0x4c5   :  { %v726_v38 = vpop.f32.mrb[10].mxu0 }
 0x4c6   :  { %v727_v39 = vadd.f32 %v934_v34, %v726_v38  ;;  %v1086_v40 = vpop.f32.mrb[11].mxu0  ;;  %v730_v41 = vmax.f32 %v724_v36, 0.0 }
 0x4c8   :  { %v731_v42 = vmax.f32 %v727_v39, 0.0 }
 0x4ca   :  { %v732_v43 = vpack.c.bf16 %v731_v42, %v730_v41 }
 0x4cc   :  { %1104 = vmatmul.mubr.bf16.vlgmr.msra.gmra.mrb[8].mxu1 %v732_v43 }
 0x59f   :  { %v838_v44 = vpop.f32.mrb[8].mxu1 }
 0x5a0   :  { %v839_v45 = vadd.f32 %v943_v0, %v838_v44  ;;  %v1105_v46 = vpop.f32.mrb[9].mxu1 }
 0x5a1   :  { %v841_v47 = vpop.f32.mrb[10].mxu1 }
 0x5a2   :  { %v842_v48 = vadd.f32 %v943_v0, %v841_v47  ;;  %v1106_v49 = vpop.f32.mrb[11].mxu1  ;;  %v846_v50 = vsel %vm845_vm2, %v839_v45, -inf }
 0x5a3   :  { %847 = vmax.xlane.f32.xlu0 %v846_v50 }
 0x5a4   :  { %v849_v51 = vsel %vm845_vm2, %v842_v48, -inf }
 0x5a7   :  { %850 = vmax.xlane.f32.xlu0 %v849_v51 }
 0x630   :  { %v848_v52 = vpop.xlane.xlu0 %847 }
 0x631   :  { %v852_v53 = vsub.f32 %v839_v45, %v848_v52 }
 0x633   :  { %v854_v54 = vmul.f32 1.442695, %v852_v53 }
 0x634   :  { %v851_v55 = vpop.xlane.xlu0 %850 }
 0x635   :  { %1174 = vpow2.f32 %v854_v54  ;;  %v853_v56 = vsub.f32 %v842_v48, %v851_v55 }
 0x637   :  { %v856_v57 = vmul.f32 1.442695, %v853_v56 }
 0x639   :  { %1176 = vpow2.f32 %v856_v57 }
 0x63f   :  { %v1175_v58 = vpop.eup %1174 }
 0x640   :  { %v858_v59 = vsel %vm845_vm2, %v1175_v58, 0.0 }
 0x641   :  { %859 = vadd.xlane.f32.xlu1 %v858_v59 }
 0x643   :  { %v1177_v60 = vpop.eup %1176 }
 0x644   :  { %v861_v61 = vsel %vm845_vm2, %v1177_v60, 0.0 }
 0x645   :  { %862 = vadd.xlane.f32.xlu1 %v861_v61 }
 0x6ce   :  { %v860_v62 = vpop.xlane.xlu1 %859 }
 0x6cf   :  { %1178 = vlog2.f32 %v860_v62 }
 0x6d2   :  { %v863_v63 = vpop.xlane.xlu1 %862 }
 0x6d3   :  { %1180 = vlog2.f32 %v863_v63 }
 0x6d9   :  { %v1179_v1 = vpop.eup %1178 }
 0x6da   :  { %v865_v2 = vmul.f32 0.6931472, %v1179_v1 }
 0x6dc   :  { %v868_v3 = vsub.f32 %v852_v53, %v865_v2 }
 0x6dd   :  { %v1181_v4 = vpop.eup %1180 }
 0x6de   :  { %870 = vst.msk [vmem:[#allocation11] sm:$0xff] %vm845_vm2, %v868_v3  ;;  %v867_v5 = vmul.f32 0.6931472, %v1181_v4 }
 0x6e0   :  { %v869_v6 = vsub.f32 %v853_v56, %v867_v5 }
 0x6e2   :  { %871 = vst.msk [vmem:[#allocation11 + $0x8] sm:$0xff] %vm845_vm2, %v869_v6 }
 0x6e3   :  { %1303 = shalt.err (!%p1300_p2)
}
 0x6e4   :  { %s1304_s1 = scalar_lea.hbm %s1685_s13, 256 }
 0x6e5   :  { %p1305_p3 = scmp.ne.s32.totalorder %s1685_s13, %s1304_s1  ;;  %p1308_p4 = scmp.lt.u32.totalorder %s1304_s1, %s1685_s13 }
 0x6e7   :  { %p1310_p5 = pnand %p1308_p4, %p1305_p3 }
 0x6e9   :  { %1313 = shalt.err (!%p1310_p5)
}
 0x6ea   :  { %883 = dma.vmem_to_hbm [thread:$0]  %s878_s11, 256, %s1685_s13, [#allocation4], %s1327_s8, %s1327_s8, %s1328_s23  }
 0x6eb   :  { %1320 = dma.done.wait [#allocation4], 256  }
 0x6ec   :  { %1321 = vsyncadd [#allocation4], 4294967040 }
 0x6ed   :  { %887 = vsyncpa [#allocation3], 1 }
 0x6ee   :  { %888 = vsyncpa [#allocation6], 1 }
 0x6ef   :  { %889 = vsyncpa [#allocation9], 1 }
 0x6f0   :  { %890 = vsyncpa [#allocation4], 1 }

</bundles_post_ra>
